<compile_context>
chip_gen: v7x
topology: tpu7x:2x2x1
jax: 0.10.0
libtpu: 0.0.40
codegen_flags: <defaults>
</compile_context>

<pallas_src>
import functools

import jax
import jax.numpy as jnp
from jax.experimental import pallas as pl
from jax.experimental.pallas import tpu as pltpu


def softmax_kernel(w_ref, tfm_ref):
    # Row-softmax (dim=1) of the raw transition matrix, emitted in bf16 for the
    # MXU.  Runs once per forward as its own tiny pallas_call.
    w = w_ref[...].astype(jnp.float32)
    w_max = jnp.max(w, axis=1, keepdims=True)
    e = jnp.exp(w - w_max)
    inv = pl.reciprocal(jnp.sum(e, axis=1, keepdims=True), approx=True)
    tfm_ref[...] = (e * inv).astype(tfm_ref.dtype)


def tfm_kernel(idx_ref, table_ref, tfm_ref, out_ref, emb_buf, *, block_rows):
    # idx_ref   : SMEM [N_pad]           int32 POI indices (scalar prefetch)
    # table_ref : VMEM [num_pois, D]     f32 embedding table (resident)
    # tfm_ref   : VMEM [D, D]            bf16 softmax(transition) (resident)
    # out_ref   : VMEM [block_rows, D]   f32 output tile
    # emb_buf   : VMEM [block_rows, D]   f32 scratch (gathered embedding tile)
    t = pl.program_id(0)
    base = t * block_rows

    # Fused gather: copy block_rows embedding rows (indices from SMEM) from the
    # VMEM-resident table into the tile buffer.  No HBM round-trip.
    @pl.loop(0, block_rows)
    def _(r):
        row = idx_ref[base + r]
        emb_buf[pl.ds(r, 1), :] = table_ref[pl.ds(row, 1), :]

    # MXU matmul with bf16 operands, f32 accumulation.
    out_ref[...] = jnp.dot(
        emb_buf[...].astype(jnp.bfloat16),
        tfm_ref[...],
        preferred_element_type=jnp.float32,
    ).astype(out_ref.dtype)


def trajectory_flow_map_forward(x, emb_table, transition, *, block_rows=128,
                                validate_indices=False):
    """Pallas-backed equivalent of TrajectoryFlowMap.forward."""
    num_pois, embed_dim = emb_table.shape
    if validate_indices:
        # Mirrors the PyTorch assert.  Off by default: it forces a device->host
        # sync and breaks tracing under jit/vmap.
        assert int(jnp.max(x)) < num_pois, "Input index out of range for embeddings"

    B, S = x.shape
    N = B * S
    D = embed_dim

    idx = x.reshape(N).astype(jnp.int32)
    n_tiles = (N + block_rows - 1) // block_rows
    n_pad = n_tiles * block_rows
    if n_pad != N:
        # Pad with index 0 (always valid); padded output rows are sliced off.
        idx = jnp.pad(idx, (0, n_pad - N))

    # --- Step 1: softmax(transition) once, in bf16, as its own tiny kernel. ---
    tfm = pl.pallas_call(
        softmax_kernel,
        out_shape=jax.ShapeDtypeStruct((D, D), jnp.bfloat16),
        cost_estimate=pl.CostEstimate(
            flops=4 * D * D,
            transcendentals=D * D,
            bytes_accessed=4 * D * D + 2 * D * D,
        ),
    )(transition.astype(jnp.float32))

    # --- Step 2: fused gather + projection over 128-row tiles. ---
    kernel = functools.partial(tfm_kernel, block_rows=block_rows)

    cost = pl.CostEstimate(
        flops=2 * n_pad * D * D,
        transcendentals=0,
        bytes_accessed=4 * (num_pois * D + n_pad * D) + 2 * D * D + 4 * n_pad,
    )

    out_flat = pl.pallas_call(
        kernel,
        out_shape=jax.ShapeDtypeStruct((n_pad, D), jnp.float32),
        grid_spec=pltpu.PrefetchScalarGridSpec(
            num_scalar_prefetch=1,
            grid=(n_tiles,),
            in_specs=[
                # Whole embedding table resident in VMEM across all steps.
                pl.BlockSpec((num_pois, D), lambda t, idx_ref: (0, 0)),
                # Softmaxed transition matrix resident in VMEM (bf16).
                pl.BlockSpec((D, D), lambda t, idx_ref: (0, 0)),
            ],
            out_specs=pl.BlockSpec((block_rows, D), lambda t, idx_ref: (t, 0)),
            scratch_shapes=[
                pltpu.VMEM((block_rows, D), jnp.float32),  # gathered emb tile
            ],
        ),
        compiler_params=pltpu.CompilerParams(
            # Row tiles are independent now (no per-core cached state), so the
            # grid axis can be split across TensorCores on v7x.
            dimension_semantics=("parallel",),
        ),
        cost_estimate=cost,
    )(idx, emb_table.astype(jnp.float32), tfm)

    return out_flat[:N].reshape(B, S, D)


def reference_forward(x, emb_table, transition):
    """Pure-JAX (f32) reference for correctness checking."""
    pe = jnp.take(emb_table, x.astype(jnp.int32), axis=0)
    tfm = jax.nn.softmax(transition, axis=1)
    return jnp.einsum("bsd,de->bse", pe, tfm)


if __name__ == "__main__":
    # Small, deterministic setup consistent with the module's __init__.
    num_pois = 64
    embed_dim = 128
    batch = 2
    seq = 8

    key = jax.random.PRNGKey(0)
    k_emb, k_trans, k_idx = jax.random.split(key, 3)

    # nn.Embedding default init: N(0, 1); transition: randn * 0.01.
    emb_table = jax.random.normal(k_emb, (num_pois, embed_dim), dtype=jnp.float32)
    transition = jax.random.normal(k_trans, (embed_dim, embed_dim),
                                   dtype=jnp.float32) * 0.01

    x = jax.random.randint(k_idx, (batch, seq), 0, num_pois, dtype=jnp.int32)

    fwd = jax.jit(trajectory_flow_map_forward)  # jittable: no host-sync assert
    out = jax.block_until_ready(fwd(x, emb_table, transition))

    ref = jax.block_until_ready(reference_forward(x, emb_table, transition))
    assert out.shape == (batch, seq, embed_dim)
    # bf16 MXU operands (f32 accumulation) + bf16 softmax matrix + approx
    # reciprocal: compare against the f32 reference with loosened tolerance.
    assert jnp.allclose(out, ref, atol=1e-2, rtol=1e-2), "Mismatch vs reference"

    print("KERNEL_OK")
</pallas_src>

<mosaic_0001>
module attributes {stable_mosaic.version = 11 : i64} {
  func.func @softmax_kernel(%arg0: memref<128x128xf32, #tpu.memory_space<vmem>>, %arg1: memref<128x128xbf16, #tpu.memory_space<vmem>>) attributes {dimension_semantics = [], scalar_prefetch = 0 : i64, scratch_operands = 0 : i64, tpu.core_type = #tpu.core_type<tc>} {
    %c0 = arith.constant 0 : index
    %c0_0 = arith.constant 0 : index
    %0 = vector.load %arg0[%c0, %c0_0] : memref<128x128xf32, #tpu.memory_space<vmem>>, vector<128x128xf32>
    %cst = arith.constant dense<0xFF800000> : vector<128xf32>
    %1 = vector.multi_reduction <maximumf>, %0, %cst [1] : vector<128x128xf32> to vector<128xf32>
    %2 = vector.shape_cast %1 : vector<128xf32> to vector<128x1xf32>
    %3 = vector.broadcast %2 : vector<128x1xf32> to vector<128x128xf32>
    %4 = arith.subf %0, %3 : vector<128x128xf32>
    %5 = math.exp %4 : vector<128x128xf32>
    %cst_1 = arith.constant dense<0.000000e+00> : vector<128xf32>
    %6 = vector.multi_reduction <add>, %5, %cst_1 [1] : vector<128x128xf32> to vector<128xf32>
    %7 = vector.shape_cast %6 : vector<128xf32> to vector<128x1xf32>
    %8 = tpu.reciprocal %7 {approx = true} : vector<128x1xf32> -> vector<128x1xf32>
    %9 = vector.broadcast %8 : vector<128x1xf32> to vector<128x128xf32>
    %10 = arith.mulf %5, %9 : vector<128x128xf32>
    %11 = arith.truncf %10 : vector<128x128xf32> to vector<128x128xbf16>
    %c0_2 = arith.constant 0 : index
    %c0_3 = arith.constant 0 : index
    %12 = vector.load %arg1[%c0_2, %c0_3] : memref<128x128xbf16, #tpu.memory_space<vmem>>, vector<128x128xbf16>
    tpu.vector_store %arg1[%c0_2, %c0_3], %11 {strides = array<i32>} : memref<128x128xbf16, #tpu.memory_space<vmem>>, vector<128x128xbf16>,
    return
  }
}

module attributes {stable_mosaic.version = 11 : i64} {
  func.func @tfm_kernel(%arg0: i32, %arg1: memref<128xi32, #tpu.memory_space<smem>>, %arg2: memref<64x128xf32, #tpu.memory_space<vmem>>, %arg3: memref<128x128xbf16, #tpu.memory_space<vmem>>, %arg4: memref<128x128xf32, #tpu.memory_space<vmem>>, %arg5: memref<128x128xf32, #tpu.memory_space<vmem>>) attributes {dimension_semantics = [#tpu.dimension_semantics<parallel>], iteration_bounds = array<i64: 1>, scalar_prefetch = 1 : i64, scratch_operands = 1 : i64, tpu.core_type = #tpu.core_type<tc>, window_params = [{pipeline_mode = #tpu.pipeline_mode<synchronous>, transform_indices = @transform_0, window_bounds = array<i64: 64, 128>}, {pipeline_mode = #tpu.pipeline_mode<synchronous>, transform_indices = @transform_1, window_bounds = array<i64: 128, 128>}, {transform_indices = @transform_2, window_bounds = array<i64: 128, 128>}]} {
    %c128_i32 = arith.constant 128 : i32
    %0 = arith.muli %arg0, %c128_i32 : i32
    %c0_i32 = arith.constant 0 : i32
    %c128_i32_0 = arith.constant 128 : i32
    %1 = arith.addi %c0_i32, %c128_i32_0 : i32
    %c1_i32 = arith.constant 1 : i32
    scf.for %arg6 = %c0_i32 to %1 step %c1_i32  : i32 {
      %c1_i32_7 = arith.constant 1 : i32
      %7 = arith.muli %arg6, %c1_i32_7 : i32
      %c0_i32_8 = arith.constant 0 : i32
      %8 = arith.addi %c0_i32_8, %7 : i32
      %9 = arith.addi %0, %8 : i32
      %10 = arith.index_cast %9 : i32 to index
      %11 = memref.load %arg1[%10] : memref<128xi32, #tpu.memory_space<smem>>
      %12 = arith.index_cast %11 : i32 to index
      %c0_9 = arith.constant 0 : index
      %13 = vector.load %arg2[%12, %c0_9] : memref<64x128xf32, #tpu.memory_space<vmem>>, vector<1x128xf32>
      %14 = arith.index_cast %8 : i32 to index
      %c0_10 = arith.constant 0 : index
      %15 = vector.load %arg5[%14, %c0_10] : memref<128x128xf32, #tpu.memory_space<vmem>>, vector<1x128xf32>
      tpu.vector_store %arg5[%14, %c0_10], %13 {strides = array<i32>} : memref<128x128xf32, #tpu.memory_space<vmem>>, vector<1x128xf32>,
    }
    %c128_i32_1 = arith.constant 128 : i32
    %c0 = arith.constant 0 : index
    %c0_2 = arith.constant 0 : index
    %2 = vector.load %arg5[%c0, %c0_2] : memref<128x128xf32, #tpu.memory_space<vmem>>, vector<128x128xf32>
    %3 = arith.truncf %2 : vector<128x128xf32> to vector<128x128xbf16>
    %c0_3 = arith.constant 0 : index
    %c0_4 = arith.constant 0 : index
    %4 = vector.load %arg3[%c0_3, %c0_4] : memref<128x128xbf16, #tpu.memory_space<vmem>>, vector<128x128xbf16>
    %cst = arith.constant dense<0.000000e+00> : vector<128x128xf32>
    %5 = tpu.matmul %3, %4, %cst {dimension_numbers = #tpu.dot_dimension_numbers<[1], [0], [0], [1], [0, 0, 1, 1], [], []>} : vector<128x128xbf16>, vector<128x128xbf16>, vector<128x128xf32> -> vector<128x128xf32>
    %c0_5 = arith.constant 0 : index
    %c0_6 = arith.constant 0 : index
    %6 = vector.load %arg4[%c0_5, %c0_6] : memref<128x128xf32, #tpu.memory_space<vmem>>, vector<128x128xf32>
    tpu.vector_store %arg4[%c0_5, %c0_6], %5 {strides = array<i32>} : memref<128x128xf32, #tpu.memory_space<vmem>>, vector<128x128xf32>,
    return
  }
  func.func @transform_0(%arg0: i32, %arg1: memref<128xi32, #tpu.memory_space<smem>>) -> (i32, i32) {
    %c0_i32 = arith.constant 0 : i32
    %c0_i32_0 = arith.constant 0 : i32
    %c0_i32_1 = arith.constant 0 : i32
    return %c0_i32, %c0_i32_0 : i32, i32
  }
  func.func @transform_1(%arg0: i32, %arg1: memref<128xi32, #tpu.memory_space<smem>>) -> (i32, i32) {
    %c0_i32 = arith.constant 0 : i32
    %c0_i32_0 = arith.constant 0 : i32
    %c0_i32_1 = arith.constant 0 : i32
    return %c0_i32, %c0_i32_0 : i32, i32
  }
  func.func @transform_2(%arg0: i32, %arg1: memref<128xi32, #tpu.memory_space<smem>>) -> (i32, i32) {
    %c0_i32 = arith.constant 0 : i32
    %c0_i32_0 = arith.constant 0 : i32
    return %arg0, %c0_i32 : i32, i32
  }
}

</mosaic_0001>

<bundles_post_ra>
// kernel: trajectory_flow_map_forward.2
= control target key start
LH: loop header
LB: loop body
LE: loop exit
PB: predicated region body
PF: predicated region fallthrough
CT: control target
= control target key end

     0   :  { %6 = vsyncpa [#allocation3], 0  ;;  %s437_s6 = smov [#allocation2]   ;;  %s574_s0 = inlined_call_operand.hbm [shape: f32[128,128], index: 0, kind: input, shape index: {}]   ;;  %s575_s1 = inlined_call_operand.vmem [shape: bf16[128,128], index: 1, kind: output, shape index: {}]  }
   0x1   :  { %s12_s7 = sshll.u32 %s437_s6, 4  ;;  %s413_s10 = scalar_lea.hbm %s574_s0, 2048  ;;  %s13_s7 = int_to_ptr.vmem [resolvable:$true] %s12_s7 }
   0x2   :  { %p414_p0 = scmp.ne.s32.totalorder %s574_s0, %s413_s10  ;;  %p417_p1 = scmp.lt.u32.totalorder %s413_s10, %s574_s0 }
   0x4   :  { %p419_p2 = pnand %p417_p1, %p414_p0 }
   0x6   :  { %422 = shalt.err (!%p419_p2)
}
   0x7   :  { %s423_s15 = scalar_lea.vmem %s13_s7, 2048  ;;  %p428_p4 = scmp.lt.s32.totalorder %s13_s7, %s13_s7 }
   0x8   :  { %p424_p3 = scmp.ne.s32.totalorder %s13_s7, %s423_s15  ;;  %p429_p5 = scmp.lt.s32.totalorder %s423_s15, %s423_s15 }
   0xa   :  { %p430_p6 = por %p429_p5, %p428_p4 }
   0xc   :  { %p431_p7 = pnand %p430_p6, %p424_p3 }
   0xe   :  { %434 = shalt.err (!%p431_p7)
}
   0xf   :  { %s438_s16 = smov 128   ;;  %s439_s17 = smov 8  }
  0x10   :  { %18 = dma.hbm_to_vmem [thread:$0]  %s574_s0, 2048, %s13_s7, [#allocation3], %s438_s16, %s438_s16, %s439_s17  }
  0x11   :  { %435 = dma.done.wait [#allocation3], 2048  }
  0x12   :  { %436 = vsyncadd [#allocation3], 4294965248  ;;  %v22_v0 = vld [vmem:[#allocation2] sm:$0xff]  ;;  %v24_v1 = vld [vmem:[#allocation2 + $0x10] sm:$0xff] }
  0x13   :  { %38 = vmax.xlane.f32.xlu0 %v22_v0  ;;  %42 = vmax.xlane.f32.xlu1 %v24_v1  ;;  %v23_v2 = vld [vmem:[#allocation2 + $0x8] sm:$0xff]  ;;  %v25_v3 = vld [vmem:[#allocation2 + $0x18] sm:$0xff]  ;;  %v26_v4 = vld [vmem:[#allocation2 + $0x20] sm:$0xff] }
  0x14   :  { %v27_v5 = vld [vmem:[#allocation2 + $0x28] sm:$0xff]  ;;  %v28_v6 = vld [vmem:[#allocation2 + $0x30] sm:$0xff]  ;;  %v29_v7 = vld [vmem:[#allocation2 + $0x38] sm:$0xff] }
  0x15   :  { %v30_v8 = vld [vmem:[#allocation2 + $0x40] sm:$0xff]  ;;  %v31_v9 = vld [vmem:[#allocation2 + $0x48] sm:$0xff]  ;;  %v462_v10 = vld [vmem:[#allocation2 + $0x50] sm:$0xff] }
  0x16   :  { %v464_v11 = vld [vmem:[#allocation2 + $0x58] sm:$0xff]  ;;  %v468_v12 = vld [vmem:[#allocation2 + $0x60] sm:$0xff]  ;;  %v470_v13 = vld [vmem:[#allocation2 + $0x68] sm:$0xff] }
  0x17   :  { %40 = vmax.xlane.f32.xlu0 %v23_v2  ;;  %44 = vmax.xlane.f32.xlu1 %v25_v3  ;;  %v474_v14 = vld [vmem:[#allocation2 + $0x70] sm:$0xff]  ;;  %v476_v15 = vld [vmem:[#allocation2 + $0x78] sm:$0xff] }
  0x1b   :  { %46 = vmax.xlane.f32.xlu0 %v26_v4  ;;  %48 = vmax.xlane.f32.xlu1 %v27_v5 }
  0x1f   :  { %50 = vmax.xlane.f32.xlu0 %v28_v6  ;;  %52 = vmax.xlane.f32.xlu1 %v29_v7 }
  0x23   :  { %54 = vmax.xlane.f32.xlu0 %v30_v8  ;;  %56 = vmax.xlane.f32.xlu1 %v31_v9 }
  0x27   :  { %58 = vmax.xlane.f32.xlu0 %v462_v10  ;;  %60 = vmax.xlane.f32.xlu1 %v464_v11 }
  0x2b   :  { %62 = vmax.xlane.f32.xlu0 %v468_v12  ;;  %64 = vmax.xlane.f32.xlu1 %v470_v13 }
  0x2f   :  { %66 = vmax.xlane.f32.xlu0 %v474_v14  ;;  %68 = vmax.xlane.f32.xlu1 %v476_v15 }
  0xa0   :  { %v39_v16 = vpop.xlane.xlu0 %38  ;;  %v43_v17 = vpop.xlane.xlu1 %42 }
  0xa1   :  { %v70_v18 = vsub.f32 %v22_v0, %v39_v16  ;;  %v72_v19 = vsub.f32 %v24_v1, %v43_v17 }
  0xa3   :  { %v86_v20 = vmul.f32 1.442695, %v70_v18  ;;  %v90_v21 = vmul.f32 1.442695, %v72_v19 }
  0xa4   :  { %v41_v22 = vpop.xlane.xlu0 %40  ;;  %v45_v23 = vpop.xlane.xlu1 %44 }
  0xa5   :  { %349 = vpow2.f32 %v86_v20  ;;  %v71_v24 = vsub.f32 %v23_v2, %v41_v22  ;;  %v73_v25 = vsub.f32 %v25_v3, %v45_v23 }
  0xa6   :  { %351 = vpow2.f32 %v90_v21 }
  0xa7   :  { %v88_v26 = vmul.f32 1.442695, %v71_v24  ;;  %v92_v27 = vmul.f32 1.442695, %v73_v25 }
  0xa8   :  { %v47_v28 = vpop.xlane.xlu0 %46  ;;  %v49_v29 = vpop.xlane.xlu1 %48 }
  0xa9   :  { %353 = vpow2.f32 %v88_v26  ;;  %v74_v30 = vsub.f32 %v26_v4, %v47_v28  ;;  %v75_v31 = vsub.f32 %v27_v5, %v49_v29 }
  0xaa   :  { %355 = vpow2.f32 %v92_v27 }
  0xab   :  { %v94_v32 = vmul.f32 1.442695, %v74_v30  ;;  %v96_v33 = vmul.f32 1.442695, %v75_v31 }
  0xac   :  { %v51_v34 = vpop.xlane.xlu0 %50  ;;  %v53_v35 = vpop.xlane.xlu1 %52 }
  0xad   :  { %357 = vpow2.f32 %v94_v32  ;;  %v76_v36 = vsub.f32 %v28_v6, %v51_v34  ;;  %v77_v37 = vsub.f32 %v29_v7, %v53_v35 }
  0xae   :  { %359 = vpow2.f32 %v96_v33 }
  0xaf   :  { %v480_v38 = vpop.eup %349  ;;  %v98_v39 = vmul.f32 1.442695, %v76_v36  ;;  %v100_v40 = vmul.f32 1.442695, %v77_v37 }
  0xb0   :  { %118 = vadd.xlane.f32.xlu0 %v480_v38  ;;  %v55_v41 = vpop.xlane.xlu0 %54  ;;  %v57_v42 = vpop.xlane.xlu1 %56 }
  0xb1   :  { %v483_v43 = vpop.eup %351  ;;  %361 = vpow2.f32 %v98_v39  ;;  %v78_v44 = vsub.f32 %v30_v8, %v55_v41  ;;  %v79_v45 = vsub.f32 %v31_v9, %v57_v42 }
  0xb2   :  { %363 = vpow2.f32 %v100_v40 }
  0xb3   :  { %v485_v46 = vpop.eup %353  ;;  %v102_v47 = vmul.f32 1.442695, %v78_v44  ;;  %v104_v48 = vmul.f32 1.442695, %v79_v45 }
  0xb4   :  { %122 = vadd.xlane.f32.xlu0 %v483_v43  ;;  %120 = vadd.xlane.f32.xlu1 %v485_v46  ;;  %v59_v49 = vpop.xlane.xlu0 %58  ;;  %v61_v50 = vpop.xlane.xlu1 %60 }
  0xb5   :  { %v489_v51 = vpop.eup %355  ;;  %365 = vpow2.f32 %v102_v47  ;;  %v80_v52 = vsub.f32 %v462_v10, %v59_v49  ;;  %v81_v53 = vsub.f32 %v464_v11, %v61_v50 }
  0xb6   :  { %367 = vpow2.f32 %v104_v48 }
  0xb7   :  { %v493_v54 = vpop.eup %357  ;;  %v106_v55 = vmul.f32 1.442695, %v80_v52  ;;  %v108_v56 = vmul.f32 1.442695, %v81_v53 }
  0xb8   :  { %124 = vadd.xlane.f32.xlu1 %v489_v51  ;;  %126 = vadd.xlane.f32.xlu0 %v493_v54  ;;  %v63_v57 = vpop.xlane.xlu0 %62  ;;  %v65_v58 = vpop.xlane.xlu1 %64 }
  0xb9   :  { %v497_v59 = vpop.eup %359  ;;  %369 = vpow2.f32 %v106_v55  ;;  %v82_v60 = vsub.f32 %v468_v12, %v63_v57  ;;  %v83_v61 = vsub.f32 %v470_v13, %v65_v58 }
  0xba   :  { %371 = vpow2.f32 %v108_v56 }
  0xbb   :  { %v501_v62 = vpop.eup %361  ;;  %v110_v63 = vmul.f32 1.442695, %v82_v60  ;;  %v112_v0 = vmul.f32 1.442695, %v83_v61 }
  0xbc   :  { %128 = vadd.xlane.f32.xlu1 %v497_v59  ;;  %130 = vadd.xlane.f32.xlu0 %v501_v62  ;;  %v67_v1 = vpop.xlane.xlu0 %66  ;;  %v69_v2 = vpop.xlane.xlu1 %68 }
  0xbd   :  { %v505_v3 = vpop.eup %363  ;;  %373 = vpow2.f32 %v110_v63  ;;  %v84_v4 = vsub.f32 %v474_v14, %v67_v1  ;;  %v85_v5 = vsub.f32 %v476_v15, %v69_v2 }
  0xbe   :  { %375 = vpow2.f32 %v112_v0 }
  0xbf   :  { %v509_v6 = vpop.eup %365  ;;  %v114_v7 = vmul.f32 1.442695, %v84_v4  ;;  %v116_v8 = vmul.f32 1.442695, %v85_v5 }
  0xc0   :  { %132 = vadd.xlane.f32.xlu1 %v505_v3  ;;  %134 = vadd.xlane.f32.xlu0 %v509_v6  ;;  %v513_v9 = vpop.eup %367 }
  0xc1   :  { %377 = vpow2.f32 %v114_v7 }
  0xc2   :  { %379 = vpow2.f32 %v116_v8 }
  0xc3   :  { %v515_v10 = vpop.eup %369 }
  0xc4   :  { %136 = vadd.xlane.f32.xlu1 %v513_v9  ;;  %138 = vadd.xlane.f32.xlu0 %v515_v10  ;;  %v519_v11 = vpop.eup %371 }
  0xc7   :  { %v521_v12 = vpop.eup %373 }
  0xc8   :  { %140 = vadd.xlane.f32.xlu1 %v519_v11  ;;  %142 = vadd.xlane.f32.xlu0 %v521_v12  ;;  %v525_v13 = vpop.eup %375 }
  0xcb   :  { %v527_v14 = vpop.eup %377 }
  0xcc   :  { %144 = vadd.xlane.f32.xlu1 %v525_v13  ;;  %146 = vadd.xlane.f32.xlu0 %v527_v14  ;;  %v531_v15 = vpop.eup %379 }
  0xd0   :  { %148 = vadd.xlane.f32.xlu1 %v531_v15 }
 0x13d   :  { %v119_v16 = vpop.xlane.xlu0 %118 }
 0x13e   :  { %381 = vrcp.f32 %v119_v16 }
 0x141   :  { %v121_v17 = vpop.xlane.xlu1 %120  ;;  %v123_v18 = vpop.xlane.xlu0 %122 }
 0x142   :  { %383 = vrcp.f32 %v121_v17 }
 0x143   :  { %385 = vrcp.f32 %v123_v18 }
 0x145   :  { %v125_v19 = vpop.xlane.xlu1 %124  ;;  %v127_v20 = vpop.xlane.xlu0 %126 }
 0x146   :  { %387 = vrcp.f32 %v125_v19 }
 0x147   :  { %389 = vrcp.f32 %v127_v20 }
 0x148   :  { %v382_v23 = vpop.eup %381 }
 0x149   :  { %v129_v21 = vpop.xlane.xlu1 %128  ;;  %v131_v22 = vpop.xlane.xlu0 %130  ;;  %v166_v25 = vmul.f32 %v382_v23, %v480_v38 }
 0x14a   :  { %391 = vrcp.f32 %v129_v21 }
 0x14b   :  { %393 = vrcp.f32 %v131_v22 }
 0x14c   :  { %v384_v24 = vpop.eup %383 }
 0x14d   :  { %v167_v26 = vmul.f32 %v384_v24, %v485_v46  ;;  %v133_v27 = vpop.xlane.xlu1 %132  ;;  %v135_v28 = vpop.xlane.xlu0 %134 }
 0x14e   :  { %v386_v29 = vpop.eup %385  ;;  %395 = vrcp.f32 %v133_v27 }
 0x14f   :  { %v302_v30 = vpack.c.bf16 %v167_v26, %v166_v25  ;;  %397 = vrcp.f32 %v135_v28  ;;  %v168_v32 = vmul.f32 %v386_v29, %v483_v43 }
 0x150   :  { %v388_v31 = vpop.eup %387 }
 0x151   :  { %303 = vst [vmem:[%s575_s1] sm:$0xff] %v302_v30   ;;  %v169_v33 = vmul.f32 %v388_v31, %v489_v51  ;;  %v137_v34 = vpop.xlane.xlu1 %136  ;;  %v139_v35 = vpop.xlane.xlu0 %138 }
 0x152   :  { %v390_v36 = vpop.eup %389  ;;  %399 = vrcp.f32 %v137_v34 }
 0x153   :  { %v307_v37 = vpack.c.bf16 %v169_v33, %v168_v32  ;;  %401 = vrcp.f32 %v139_v35  ;;  %v170_v39 = vmul.f32 %v390_v36, %v493_v54 }
 0x154   :  { %v392_v38 = vpop.eup %391 }
 0x155   :  { %339 = vst [vmem:[%s575_s1 + $0x8] sm:$0xff] %v307_v37   ;;  %v171_v40 = vmul.f32 %v392_v38, %v497_v59  ;;  %v141_v41 = vpop.xlane.xlu1 %140  ;;  %v143_v42 = vpop.xlane.xlu0 %142 }
 0x156   :  { %v394_v43 = vpop.eup %393  ;;  %403 = vrcp.f32 %v141_v41 }
 0x157   :  { %v312_v44 = vpack.c.bf16 %v171_v40, %v170_v39  ;;  %405 = vrcp.f32 %v143_v42  ;;  %v172_v46 = vmul.f32 %v394_v43, %v501_v62 }
 0x158   :  { %v396_v45 = vpop.eup %395 }
 0x159   :  { %340 = vst [vmem:[%s575_s1 + $0x10] sm:$0xff] %v312_v44   ;;  %v173_v47 = vmul.f32 %v396_v45, %v505_v3  ;;  %v145_v48 = vpop.xlane.xlu1 %144  ;;  %v147_v49 = vpop.xlane.xlu0 %146 }
 0x15a   :  { %v398_v50 = vpop.eup %397  ;;  %407 = vrcp.f32 %v145_v48 }
 0x15b   :  { %v317_v51 = vpack.c.bf16 %v173_v47, %v172_v46  ;;  %409 = vrcp.f32 %v147_v49  ;;  %v174_v53 = vmul.f32 %v398_v50, %v509_v6 }
 0x15c   :  { %v400_v52 = vpop.eup %399 }
 0x15d   :  { %341 = vst [vmem:[%s575_s1 + $0x18] sm:$0xff] %v317_v51   ;;  %v175_v54 = vmul.f32 %v400_v52, %v513_v9  ;;  %v149_v55 = vpop.xlane.xlu1 %148  ;;  %v402_v56 = vpop.eup %401 }
 0x15e   :  { %411 = vrcp.f32 %v149_v55  ;;  %v176_v59 = vmul.f32 %v402_v56, %v515_v10 }
 0x15f   :  { %v322_v57 = vpack.c.bf16 %v175_v54, %v174_v53 }
 0x160   :  { %v404_v58 = vpop.eup %403 }
 0x161   :  { %342 = vst [vmem:[%s575_s1 + $0x20] sm:$0xff] %v322_v57   ;;  %v177_v60 = vmul.f32 %v404_v58, %v519_v11  ;;  %v406_v61 = vpop.eup %405 }
 0x162   :  { %v178_v0 = vmul.f32 %v406_v61, %v521_v12 }
 0x163   :  { %v327_v62 = vpack.c.bf16 %v177_v60, %v176_v59 }
 0x164   :  { %v408_v63 = vpop.eup %407 }
 0x165   :  { %343 = vst [vmem:[%s575_s1 + $0x28] sm:$0xff] %v327_v62   ;;  %v179_v1 = vmul.f32 %v408_v63, %v525_v13  ;;  %v410_v2 = vpop.eup %409 }
 0x166   :  { %v180_v5 = vmul.f32 %v410_v2, %v527_v14 }
 0x167   :  { %v332_v3 = vpack.c.bf16 %v179_v1, %v178_v0 }
 0x168   :  { %v412_v4 = vpop.eup %411 }
 0x169   :  { %344 = vst [vmem:[%s575_s1 + $0x30] sm:$0xff] %v332_v3   ;;  %v181_v6 = vmul.f32 %v412_v4, %v531_v15 }
 0x16b   :  { %v337_v7 = vpack.c.bf16 %v181_v6, %v180_v5 }
 0x16d   :  { %345 = vst [vmem:[%s575_s1 + $0x38] sm:$0xff] %v337_v7  }
 0x16e   :  { %266 = vsyncpa [#allocation3], 1 }

// kernel: trajectory_flow_map_forward.3
= control target key start
LH: loop header
LB: loop body
LE: loop exit
PB: predicated region body
PF: predicated region fallthrough
CT: control target
= control target key end

     0   :  { %s454_s0 = inlined_call_operand.vmem [shape: s32[128], index: 0, kind: input, shape index: {}]   ;;  %s455_s1 = inlined_call_operand.vmem [shape: f32[64,128], index: 1, kind: input, shape index: {}]   ;;  %s456_s2 = inlined_call_operand.vmem [shape: bf16[128,128], index: 2, kind: input, shape index: {}]   ;;  %s457_s3 = inlined_call_operand.vmem [shape: f32[128,128], index: 3, kind: output, shape index: {}]  }
   0x1   :  { %s8_s14 = sshll.u32 %s454_s0, 4  ;;  %s9_s14 = int_to_ptr.vmem [resolvable:$true] %s8_s14 }
   0x2   :  { %s333_s15 = scalar_lea.vmem %s9_s14, 16  ;;  %p338_p1 = scmp.lt.s32.totalorder %s9_s14, %s9_s14 }
   0x3   :  { %p334_p0 = scmp.ne.s32.totalorder %s9_s14, %s333_s15  ;;  %p339_p2 = scmp.lt.s32.totalorder %s333_s15, %s333_s15 }
   0x5   :  { %p340_p3 = por %p339_p2, %p338_p1 }
   0x7   :  { %p341_p4 = pnand %p340_p3, %p334_p0 }
   0x9   :  { %344 = shalt.err (!%p341_p4)  }
   0xa   :  { %s355_s16 = smov [#allocation4]  }
   0xb   :  { %11 = dma.vmem_to_smem %s9_s14, 16, %s355_s16, [#allocation3] }
   0xc   :  { %349 = dma.done.wait [#allocation3], 16 }
   0xd   :  { %350 = vsyncadd [#allocation3], 4294967280 }
   0xe   :  { %13 = sfence }
   0xf   :  { %s351_s17 = smov 0  }
  0x10 LB: > { %s27_s18 = sld [smem:[#allocation4 + %s353_s17]]  ;;  %s30_s21 = scalar_lea.vmem [#allocation2], %s353_s17  ;;  %s353_s17 = sphi %s351_s17, %s25_s17  }
  0x11   : > { %s25_s17 = sadd.s32 1, %s353_s17  }
  0x12   : > { %p22_p5 = scmp.ge.s32.totalorder %s25_s17, 128  }
  0x13   :  { %v325_v1 = vld [vmem:[%s456_s2] sm:$0xff] (%p22_p5)   ;;  %v326_v2 = vld [vmem:[%s456_s2 + $0x8] sm:$0xff] (%p22_p5)   ;;  %v327_v3 = vld [vmem:[%s456_s2 + $0x10] sm:$0xff] (%p22_p5)  }
  0x14   :  { %24 = sbr.rel (!%p22_p5) target bundleno = 16 (0x10), region = 37  ;;  %268 = vmatprep.subr.bf16.mxu0 (%p22_p5), %v325_v1  ;;  %300 = vmatprep.subr.bf16.mxu1 (%p22_p5), %v325_v1  ;;  %v328_v4 = vld [vmem:[%s456_s2 + $0x18] sm:$0xff] (%p22_p5)   ;;  %v329_v11 = vld [vmem:[%s456_s2 + $0x20] sm:$0xff] (%p22_p5)   ;;  %v330_v12 = vld [vmem:[%s456_s2 + $0x28] sm:$0xff] (%p22_p5)  }
  0x15   :  { %269 = vmatpush3.bf16.msra.mxu0 (%p22_p5), %v325_v1  ;;  %308 = vmatpush3.bf16.msra.mxu1 (%p22_p5), %v325_v1  ;;  %v331_v13 = vld [vmem:[%s456_s2 + $0x30] sm:$0xff] (%p22_p5)   ;;  %v332_v14 = vld [vmem:[%s456_s2 + $0x38] sm:$0xff] (%p22_p5)  }
  0x16   : > { %s28_s20 = scalar_lea.vmem %s455_s1, %s27_s18  ;;  %270 = vmatprep.subr.bf16.mxu0 (%p22_p5), %v326_v2  ;;  %301 = vmatprep.subr.bf16.mxu1 (%p22_p5), %v326_v2 }
  0x17   : > { %v29_v0 = vld [vmem:[%s28_s20] sm:$0x1] }
  0x18   : > { %31 = vst [vmem:[%s30_s21] sm:$0x1] %v29_v0 }
  0x19   :  { %271 = vmatpush3.bf16.msra.mxu0 (%p22_p5), %v326_v2  ;;  %309 = vmatpush3.bf16.msra.mxu1 (%p22_p5), %v326_v2 }
  0x1a   :  { %272 = vmatprep.subr.bf16.mxu0 (%p22_p5), %v327_v3  ;;  %302 = vmatprep.subr.bf16.mxu1 (%p22_p5), %v327_v3 }
  0x1d   :  { %273 = vmatpush3.bf16.msra.mxu0 %v327_v3  ;;  %310 = vmatpush3.bf16.msra.mxu1 %v327_v3 }
  0x1e   :  { %274 = vmatprep.subr.bf16.mxu0 %v328_v4  ;;  %303 = vmatprep.subr.bf16.mxu1 %v328_v4 }
  0x1f   :  { %v32_v5 = vld [vmem:[#allocation2] sm:$0xff]  ;;  %v33_v6 = vld [vmem:[#allocation2 + $0x8] sm:$0xff]  ;;  %v34_v15 = vld [vmem:[#allocation2 + $0x10] sm:$0xff] }
  0x20   :  { %v40_v7 = vld [vmem:[#allocation2 + $0x40] sm:$0xff]  ;;  %v48_v8 = vpack.c.bf16 %v33_v6, %v32_v5  ;;  %v41_v9 = vld [vmem:[#allocation2 + $0x48] sm:$0xff]  ;;  %v35_v16 = vld [vmem:[#allocation2 + $0x18] sm:$0xff] }
  0x21   :  { %v52_v10 = vpack.c.bf16 %v41_v9, %v40_v7  ;;  %275 = vmatpush3.bf16.msra.mxu0 %v328_v4  ;;  %311 = vmatpush3.bf16.msra.mxu1 %v328_v4  ;;  %v42_v17 = vld [vmem:[#allocation2 + $0x50] sm:$0xff]  ;;  %v43_v18 = vld [vmem:[#allocation2 + $0x58] sm:$0xff]  ;;  %v36_v19 = vld [vmem:[#allocation2 + $0x20] sm:$0xff]  ;;  %v49_v23 = vpack.c.bf16 %v35_v16, %v34_v15 }
  0x22   :  { %284 = vmatprep.mubr.bf16.mxu0 %v48_v8  ;;  %276 = vmatprep.subr.bf16.mxu0 %v329_v11  ;;  %v37_v20 = vld [vmem:[#allocation2 + $0x28] sm:$0xff]  ;;  %v44_v21 = vld [vmem:[#allocation2 + $0x60] sm:$0xff]  ;;  %v53_v24 = vpack.c.bf16 %v43_v18, %v42_v17  ;;  %v38_v27 = vld [vmem:[#allocation2 + $0x30] sm:$0xff] }
  0x23   :  { %292 = vmatprep.mubr.bf16.mxu1 %v52_v10  ;;  %304 = vmatprep.subr.bf16.mxu1 %v329_v11  ;;  %v45_v22 = vld [vmem:[#allocation2 + $0x68] sm:$0xff]  ;;  %v50_v25 = vpack.c.bf16 %v37_v20, %v36_v19  ;;  %v39_v28 = vld [vmem:[#allocation2 + $0x38] sm:$0xff]  ;;  %v46_v29 = vld [vmem:[#allocation2 + $0x70] sm:$0xff] }
  0x24   :  { %v54_v26 = vpack.c.bf16 %v45_v22, %v44_v21  ;;  %v47_v30 = vld [vmem:[#allocation2 + $0x78] sm:$0xff]  ;;  %v51_v31 = vpack.c.bf16 %v39_v28, %v38_v27 }
  0x25   :  { %277 = vmatpush3.bf16.msra.mxu0 %v329_v11  ;;  %312 = vmatpush3.bf16.msra.mxu1 %v329_v11  ;;  %v55_v32 = vpack.c.bf16 %v47_v30, %v46_v29 }
  0x26   :  { %278 = vmatprep.subr.bf16.mxu0 %v330_v12  ;;  %305 = vmatprep.subr.bf16.mxu1 %v330_v12 }
  0x29   :  { %279 = vmatpush3.bf16.msra.mxu0 %v330_v12  ;;  %313 = vmatpush3.bf16.msra.mxu1 %v330_v12 }
  0x2a   :  { %280 = vmatprep.subr.bf16.mxu0 %v331_v13  ;;  %306 = vmatprep.subr.bf16.mxu1 %v331_v13 }
  0x2d   :  { %281 = vmatpush3.bf16.msra.mxu0 %v331_v13  ;;  %314 = vmatpush3.bf16.msra.mxu1 %v331_v13 }
  0x2e   :  { %282 = vmatprep.subr.bf16.mxu0 %v332_v14  ;;  %307 = vmatprep.subr.bf16.mxu1 %v332_v14 }
  0x31   :  { %283 = vmatpush3.bf16.msra.mxu0 %v332_v14  ;;  %315 = vmatpush3.bf16.msra.mxu1 %v332_v14 }
  0x34   :  { %285 = vmatmul.mubr.bf16.vlgmr.msra.gmra.mrb[0].mxu0 %v49_v23  ;;  %293 = vmatmul.mubr.bf16.vlgmr.msra.gmra.mrb[0].mxu1 %v53_v24 }
  0x35   :  { %288 = vmatprep.mubr.bf16.mxu0 %v50_v25  ;;  %296 = vmatprep.mubr.bf16.mxu1 %v54_v26 }
  0x3c   :  { %289 = vmatmul.mubr.bf16.gmra.mrb[4].mxu0 %v51_v31  ;;  %297 = vmatmul.mubr.bf16.gmra.mrb[4].mxu1 %v55_v32 }
 0x107   :  { %v286_v33 = vpop.f32.mrb[0].mxu0  ;;  %v294_v34 = vpop.f32.mrb[0].mxu1 }
 0x108   :  { %219 = vst [vmem:[%s457_s3 + $0x10] sm:$0xff] %v286_v33  ;;  %227 = vst [vmem:[%s457_s3 + $0x50] sm:$0xff] %v294_v34  ;;  %v154_v35 = vpop.f32.mrb[1].mxu0  ;;  %v186_v36 = vpop.f32.mrb[1].mxu1 }
 0x109   :  { %217 = vst [vmem:[%s457_s3] sm:$0xff] %v154_v35  ;;  %225 = vst [vmem:[%s457_s3 + $0x40] sm:$0xff] %v186_v36  ;;  %v287_v37 = vpop.f32.mrb[2].mxu0  ;;  %v295_v38 = vpop.f32.mrb[2].mxu1 }
 0x10a   :  { %220 = vst [vmem:[%s457_s3 + $0x18] sm:$0xff] %v287_v37  ;;  %228 = vst [vmem:[%s457_s3 + $0x58] sm:$0xff] %v295_v38  ;;  %v157_v39 = vpop.f32.mrb[3].mxu0  ;;  %v189_v40 = vpop.f32.mrb[3].mxu1 }
 0x10b   :  { %218 = vst [vmem:[%s457_s3 + $0x8] sm:$0xff] %v157_v39  ;;  %226 = vst [vmem:[%s457_s3 + $0x48] sm:$0xff] %v189_v40 }
 0x10f   :  { %v290_v41 = vpop.f32.mrb[4].mxu0  ;;  %v298_v42 = vpop.f32.mrb[4].mxu1 }
 0x110   :  { %223 = vst [vmem:[%s457_s3 + $0x30] sm:$0xff] %v290_v41  ;;  %231 = vst [vmem:[%s457_s3 + $0x70] sm:$0xff] %v298_v42  ;;  %v170_v43 = vpop.f32.mrb[5].mxu0  ;;  %v202_v44 = vpop.f32.mrb[5].mxu1 }
 0x111   :  { %221 = vst [vmem:[%s457_s3 + $0x20] sm:$0xff] %v170_v43  ;;  %229 = vst [vmem:[%s457_s3 + $0x60] sm:$0xff] %v202_v44  ;;  %v291_v45 = vpop.f32.mrb[6].mxu0  ;;  %v299_v46 = vpop.f32.mrb[6].mxu1 }
 0x112   :  { %224 = vst [vmem:[%s457_s3 + $0x38] sm:$0xff] %v291_v45  ;;  %232 = vst [vmem:[%s457_s3 + $0x78] sm:$0xff] %v299_v46  ;;  %v173_v47 = vpop.f32.mrb[7].mxu0  ;;  %v205_v48 = vpop.f32.mrb[7].mxu1 }
 0x113   :  { %222 = vst [vmem:[%s457_s3 + $0x28] sm:$0xff] %v173_v47  ;;  %230 = vst [vmem:[%s457_s3 + $0x68] sm:$0xff] %v205_v48 }

</bundles_post_ra>
